<compile_context>
chip_gen: v5e
topology: v5e:2x2
jax: 0.10.0
libtpu: 0.0.40
codegen_flags: <defaults>
</compile_context>

<pallas_src>
import functools

import jax
import jax.numpy as jnp
from jax import lax
from jax.experimental import pallas as pl
from jax.experimental.pallas import tpu as pltpu

LANES = 128
TILE_M_MAX = 1024   # (1024, 128) f32 block = 512 KiB; x2 pipeline buffers = 1 MiB VMEM


def _neg_penalty_kernel(x_ref, out_ref, acc_ref, *, rows, tile_m, has_tail):
    i = pl.program_id(0)
    nsteps = pl.num_programs(0)

    @pl.when(i == 0)
    def _init():
        acc_ref[...] = jnp.zeros_like(acc_ref)

    def _accum_full():
        # Fast path: min + add, 2 VALU ops per vreg.  Cast to f32 in-kernel so
        # the HBM-side array keeps its native (possibly narrow) dtype.
        neg = jnp.minimum(x_ref[...].astype(jnp.float32), 0.0)
        # Sublane-grouped reshape is layout-preserving ((8,128)-aligned); the
        # axis-0 sum stays on the VPU (no XLU reduce in steady state).
        acc_ref[...] += jnp.sum(neg.reshape(tile_m // 8, 8, LANES), axis=0)

    if has_tail:
        # Only the last tile extends past `rows`; every interior tile stays on
        # the unmasked fast path.
        is_tail = i == nsteps - 1

        @pl.when(jnp.logical_not(is_tail))
        def _interior():
            _accum_full()

        @pl.when(is_tail)
        def _tail():
            rids = i * tile_m + lax.broadcasted_iota(
                jnp.int32, (tile_m, LANES), 0)
            neg = jnp.where(
                rids < rows,
                jnp.minimum(x_ref[...].astype(jnp.float32), 0.0),
                0.0)
            acc_ref[...] += jnp.sum(neg.reshape(tile_m // 8, 8, LANES), axis=0)
    else:
        _accum_full()

    # Pay the cross-lane/sublane reduce + negate + scalar store exactly once.
    @pl.when(i == nsteps - 1)
    def _finalize():
        out_ref[0, 0] = -jnp.sum(acc_ref[...])


def _round_up(a, b):
    return ((a + b - 1) // b) * b


def neg_penalty_loss(x):
    numel = x.size
    if numel == 0:
        # TODO(synk): PyTorch returns a grad-requiring 0.0 tensor; here just f32 0.0.
        return jnp.float32(0.0)

    flat = jnp.ravel(x)

    # Lane-ragged remainder (< 128 elements): tiny pure-JAX reduction instead
    # of padding (and rewriting) the whole array.
    rem = numel % LANES
    main = numel - rem
    tail_sum = jnp.float32(0.0)
    if rem:
        # TODO(synk): the prefix slice may still copy under XLA; only taken
        # when numel % 128 != 0 (never for the demo shapes).
        tail_sum = -jnp.sum(jnp.minimum(flat[main:].astype(jnp.float32), 0.0))
        flat = flat[:main]
    if main == 0:
        return tail_sum / jnp.float32(numel)

    rows = main // LANES
    x2d = flat.reshape(rows, LANES)   # lane-dense view; free for contiguous input

    # Row-tile size: as big as possible up to TILE_M_MAX, rounded up to the
    # dtype's packed-sublane multiple (8 f32 / 16 bf16 / 32 int8,fp8).
    itemsize = jnp.dtype(x.dtype).itemsize
    sublane = 8 * max(1, 4 // itemsize)
    tile_m = min(TILE_M_MAX, _round_up(rows, sublane))
    nsteps = pl.cdiv(rows, tile_m)
    has_tail = (rows % tile_m) != 0

    kernel = functools.partial(
        _neg_penalty_kernel, rows=rows, tile_m=tile_m, has_tail=has_tail)

    cost = pl.CostEstimate(
        flops=2 * main,
        transcendentals=0,
        bytes_accessed=main * itemsize + 4)

    partial = pl.pallas_call(
        kernel,
        out_shape=jax.ShapeDtypeStruct((1, 1), jnp.float32),
        grid_spec=pltpu.PrefetchScalarGridSpec(
            num_scalar_prefetch=0,
            grid=(nsteps,),
            in_specs=[pl.BlockSpec((tile_m, LANES), lambda i: (i, 0))],
            out_specs=pl.BlockSpec((1, 1), lambda i: (0, 0),
                                   memory_space=pltpu.SMEM),
            scratch_shapes=[pltpu.VMEM((8, LANES), jnp.float32)],
        ),
        compiler_params=pltpu.CompilerParams(
            dimension_semantics=("arbitrary",)),
        cost_estimate=cost,
    )(x2d)

    # Keep the loss in f32 (don't downcast to the input dtype).
    return (partial[0, 0] + tail_sum) / jnp.float32(numel)


if __name__ == "__main__":
    key = jax.random.PRNGKey(0)
    x = jax.random.normal(key, (2, 4, 16, 16), dtype=jnp.float32)

    loss = neg_penalty_loss(x)
    jax.block_until_ready(loss)

    # Sanity check against a pure-JAX reference.
    ref = jnp.sum(jnp.where(x < 0, -x, 0.0)) / x.size
    assert jnp.allclose(loss, ref, rtol=1e-5, atol=1e-6), (loss, ref)

    print("KERNEL_OK")
</pallas_src>

<mosaic_0001>
module attributes {stable_mosaic.version = 11 : i64} {
  func.func @_neg_penalty_kernel(%arg0: i32, %arg1: memref<16x128xf32, #tpu.memory_space<vmem>>, %arg2: memref<1x1xf32, #tpu.memory_space<smem>>, %arg3: memref<8x128xf32, #tpu.memory_space<vmem>>) attributes {dimension_semantics = [#tpu.dimension_semantics<arbitrary>], iteration_bounds = array<i64: 1>, scalar_prefetch = 0 : i64, scratch_operands = 1 : i64, tpu.core_type = #tpu.core_type<tc>, window_params = [{transform_indices = @transform_0, window_bounds = array<i64: 16, 128>}, {transform_indices = @transform_1, window_bounds = array<i64: 1, 1>}]} {
    %c0_i32 = arith.constant 0 : i32
    %0 = arith.cmpi eq, %arg0, %c0_i32 : i32
    %1 = arith.extui %0 : i1 to i32
    %c0_i32_0 = arith.constant 0 : i32
    %2 = arith.cmpi ne, %1, %c0_i32_0 : i32
    scf.if %2 {
      %cst_9 = arith.constant 0.000000e+00 : f32
      %14 = vector.broadcast %cst_9 : f32 to vector<8x128xf32>
      %c0_10 = arith.constant 0 : index
      %c0_11 = arith.constant 0 : index
      %15 = vector.load %arg3[%c0_10, %c0_11] : memref<8x128xf32, #tpu.memory_space<vmem>>, vector<8x128xf32>
      tpu.vector_store %arg3[%c0_10, %c0_11], %14 {strides = array<i32>} : memref<8x128xf32, #tpu.memory_space<vmem>>, vector<8x128xf32>,
    } else {
    }
    %c0 = arith.constant 0 : index
    %c0_1 = arith.constant 0 : index
    %3 = vector.load %arg1[%c0, %c0_1] : memref<16x128xf32, #tpu.memory_space<vmem>>, vector<16x128xf32>
    %cst = arith.constant 0.000000e+00 : f32
    %4 = vector.broadcast %cst : f32 to vector<16x128xf32>
    %5 = arith.minimumf %3, %4 : vector<16x128xf32>
    %c0_2 = arith.constant 0 : index
    %c0_3 = arith.constant 0 : index
    %6 = vector.load %arg3[%c0_2, %c0_3] : memref<8x128xf32, #tpu.memory_space<vmem>>, vector<8x128xf32>
    %7 = vector.shape_cast %5 : vector<16x128xf32> to vector<2x8x128xf32>
    %cst_4 = arith.constant dense<0.000000e+00> : vector<8x128xf32>
    %8 = vector.multi_reduction <add>, %7, %cst_4 [0] : vector<2x8x128xf32> to vector<8x128xf32>
    %9 = arith.addf %6, %8 : vector<8x128xf32>
    %c0_5 = arith.constant 0 : index
    %c0_6 = arith.constant 0 : index
    %10 = vector.load %arg3[%c0_5, %c0_6] : memref<8x128xf32, #tpu.memory_space<vmem>>, vector<8x128xf32>
    tpu.vector_store %arg3[%c0_5, %c0_6], %9 {strides = array<i32>} : memref<8x128xf32, #tpu.memory_space<vmem>>, vector<8x128xf32>,
    %c0_i32_7 = arith.constant 0 : i32
    %11 = arith.cmpi eq, %arg0, %c0_i32_7 : i32
    %12 = arith.extui %11 : i1 to i32
    %c0_i32_8 = arith.constant 0 : i32
    %13 = arith.cmpi ne, %12, %c0_i32_8 : i32
    scf.if %13 {
      %c0_9 = arith.constant 0 : index
      %c0_10 = arith.constant 0 : index
      %14 = vector.load %arg3[%c0_9, %c0_10] : memref<8x128xf32, #tpu.memory_space<vmem>>, vector<8x128xf32>
      %15 = vector.shape_cast %14 : vector<8x128xf32> to vector<1x8x128xf32>
      %cst_11 = arith.constant dense<0.000000e+00> : vector<1xf32>
      %16 = vector.multi_reduction <add>, %15, %cst_11 [1, 2] : vector<1x8x128xf32> to vector<1xf32>
      %17 = vector.shape_cast %16 : vector<1xf32> to vector<1x1x1xf32>
      %18 = vector.extract %17[0, 0, 0] : f32 from vector<1x1x1xf32>
      %cst_12 = arith.constant 0.000000e+00 : f32
      %19 = arith.subf %cst_12, %18 : f32
      %c0_13 = arith.constant 0 : index
      %c0_14 = arith.constant 0 : index
      %20 = memref.load %arg2[%c0_13, %c0_14] : memref<1x1xf32, #tpu.memory_space<smem>>
      memref.store %19, %arg2[%c0_13, %c0_14] : memref<1x1xf32, #tpu.memory_space<smem>>
    } else {
    }
    return
  }
  func.func @transform_0(%arg0: i32) -> (i32, i32) {
    %c0_i32 = arith.constant 0 : i32
    %c0_i32_0 = arith.constant 0 : i32
    return %arg0, %c0_i32 : i32, i32
  }
  func.func @transform_1(%arg0: i32) -> (i32, i32) {
    %c0_i32 = arith.constant 0 : i32
    %c0_i32_0 = arith.constant 0 : i32
    %c0_i32_1 = arith.constant 0 : i32
    return %c0_i32, %c0_i32_0 : i32, i32
  }
}

</mosaic_0001>

<bundles_post_ra>
// kernel: tpu_custom_call.1
= control target key start
LH: loop header
LB: loop body
LE: loop exit
PB: predicated region body
PF: predicated region fallthrough
CT: control target
= control target key end

     0   :  { %6 = vsyncpa [#allocation4], 0  ;;  %s136_s0 = inlined_call_operand.hbm [shape: f32[16,128], index: 0, kind: input, shape index: {}]   ;;  %s137_s1 = inlined_call_operand.hbm [shape: f32[1,1], index: 1, kind: output, shape index: {}]  }
   0x1   :  { %7 = vsyncpa [#allocation5], 0  ;;  %s12_s8 = sshll.u32 %s136_s0, 4  ;;  %s116_s9 = smov [#allocation3]   ;;  %s13_s8 = int_to_ptr.hbm [resolvable:$true] %s12_s8 }
   0x2   :  { %s14_s10 = sshll.u32 %s116_s9, 4  ;;  %s117_s11 = smov 128   ;;  %s15_s10 = int_to_ptr.vmem [resolvable:$true] %s14_s10 }
   0x3   :  { %s118_s12 = smov 8  }
   0x4   :  { %20 = dma.hbm_to_vmem [thread:$0]  %s13_s8, 256, %s15_s10, [#allocation4], %s117_s11, %s117_s11, %s118_s12  }
   0x5   :  { %112 = dma.done.wait [#allocation4], 256  }
   0x6   :  { %113 = vsyncadd [#allocation4], 4294967040  ;;  %v30_v0 = vld [vmem:[#allocation3] sm:$0xff]  ;;  %v31_v1 = vld [vmem:[#allocation3 + $0x8] sm:$0xff]  ;;  %s59_s14 = sshll.u32 %s137_s1, 4  ;;  %s119_s17 = smov [#allocation6]   ;;  %s60_s14 = int_to_ptr.hbm [resolvable:$true] %s59_s14 }
   0x7   :  { %v32_v2 = vmin.f32 %v30_v0, 0.0  ;;  %v33_v3 = vmin.f32 %v31_v1, 0.0 }
   0x9   :  { %v35_v4 = vadd.f32 %v33_v3, %v32_v2 }
   0xb   :  { %42 = vadd.xlane.f32.xlu0 %v35_v4 }
  0x7e   :  { %v43_v5 = vpop.xlane.xlu0 %42 }
  0x7f   :  { %v44_v6 = vrot.slane %v43_v5, 4 }
  0x81   :  { %v45_v7 = vadd.f32 %v44_v6, %v43_v5 }
  0x83   :  { %v46_v8 = vrot.slane %v45_v7, 2 }
  0x85   :  { %v47_v9 = vadd.f32 %v46_v8, %v45_v7 }
  0x87   :  { %v48_v10 = vrot.slane %v47_v9, 1 }
  0x89   :  { %v49_v11 = vadd.f32 %v48_v10, %v47_v9 }
  0x8b   :  { %70 = vpush %v49_v11 }
  0xbc   :  { %s71_s15 = spop %70 }
  0xbd   :  { %s51_s16 = ssub.f32 0.0, %s71_s15 }
  0xbf   :  { %53 = sst [smem:[#allocation6]] %s51_s16 }
  0xc0   :  { %62 = dma.smem_to_hbm %s119_s17, 16, %s60_s14, [#allocation5]  }
  0xc1   :  { %114 = dma.done.wait [#allocation5], 16  }
  0xc2   :  { %115 = vsyncadd [#allocation5], 4294967280 }
  0xc3   :  { %67 = sfence }
  0xc4   :  { %68 = vsyncpa [#allocation4], 1 }
  0xc5   :  { %69 = vsyncpa [#allocation5], 1 }

</bundles_post_ra>
